<compile_context>
chip_gen: v5e
topology: v5e:2x2
jax: 0.10.0
libtpu: 0.0.40
codegen_flags: <defaults>
</compile_context>

<pallas_src>
import functools

import jax
import jax.numpy as jnp
from jax.experimental import pallas as pl
from jax.experimental.pallas import tpu as pltpu

MARGIN = 4.0
EPS = 1e-12


def _vmem_budgets():
    """Per-generation VMEM budgets: (per-step block budget, vmem_limit_bytes)."""
    cap = 64 * 1024 * 1024                      # conservative fallback (v7x per-TC)
    try:
        info = pltpu.get_tpu_info()
        cap = int(getattr(info, "vmem_capacity_bytes", cap) or cap)
    except Exception:
        pass
    # ~45% of capacity for the pipelined block working set, ~75% scoped limit:
    # v7x (64 MiB)  -> ~28 / 48 MiB,  v5e/v6e (128 MiB) -> ~57 / 96 MiB.
    return int(cap * 0.45), int(cap * 0.75)


def _bytes_per_batch_col(d, in_itemsize):
    """VMEM bytes per batch column of one grid step (inputs + f32 working set)."""
    input_dbuf = 3 * 2 * d * in_itemsize        # h, t, r blocks, double-buffered
    f32_live = 3 * d * 4                        # running sum + normalized operand + slack
    return input_dbuf + f32_live


def _choose_block_b(batch_padded, d, in_itemsize, block_budget,
                    min_grid_steps=2, max_tb=8192):
    """Largest 128-multiple batch tile dividing the padded batch that fits VMEM."""
    assert batch_padded % 128 == 0
    per_col = _bytes_per_batch_col(d, in_itemsize)
    best_any = None
    for tb in range(min(batch_padded, max_tb), 127, -128):
        if batch_padded % tb:
            continue
        if tb * per_col > block_budget:
            continue
        if batch_padded // tb >= min_grid_steps:
            return tb                           # biggest tile that keeps >=2 steps
        if best_any is None:
            best_any = tb                       # e.g. batch_padded == 128
    if best_any is not None:
        return best_any
    raise ValueError(
        f"no 128-aligned batch tile (<= {max_tb}) fits the VMEM block budget "
        f"({block_budget} B) for D={d}; tile the embedding dimension instead.")


def _negative_sampling_kernel(h_ref, t_ref, r_ref, out_ref, p_sc, *, margin):
    """One (batch tile, slab) step of the TransE L1 score + margin hinge.

    h_ref, t_ref, r_ref: (D, TB) VMEM tiles (batch on the lane axis).
    out_ref:             (1, TB) f32 block, resident across the slab axis; holds the
                         per-batch-element hinge sum over all negative slabs.
    p_sc:                (1, TB) f32 scratch carrying the positive-slab score.
    """
    k = pl.program_id(1)                        # slab index: 0 = positive, >0 = negatives

    def l2n(x):
        # rsqrt goes to the EUP slot (cheaper than sqrt + divide on the VALU).
        ss = jnp.sum(x * x, axis=0, keepdims=True)             # (1, TB)
        return x * jax.lax.rsqrt(jnp.maximum(ss, EPS * EPS))   # == x / max(||x||, EPS)

    # Normalize one operand at a time so at most ~2 f32 (D, TB) tiles are live.
    s = l2n(h_ref[...].astype(jnp.float32))
    s = s + l2n(r_ref[...].astype(jnp.float32))
    s = s - l2n(t_ref[...].astype(jnp.float32))
    score = jnp.sum(jnp.abs(s), axis=0, keepdims=True)         # (1, TB), p_norm = 1

    @pl.when(k == 0)
    def _():                                    # positive slab: stash p, zero output
        p_sc[...] = score
        out_ref[...] = jnp.zeros_like(out_ref)

    @pl.when(k > 0)
    def _():                                    # negative slabs: accumulate the hinge
        out_ref[...] += jnp.maximum(p_sc[...] - score, -margin)


def negative_sampling_forward(ent_emb, rel_emb, batch_h, batch_t, batch_r,
                              batch_size, margin=MARGIN, block_b=None,
                              compute_dtype=jnp.bfloat16, relations_repeated=False,
                              min_grid_steps=2):
    """JAX glue (embedding gather, padding) + the tiled/pipelined Pallas kernel."""
    n_total = batch_h.shape[0]
    assert n_total % batch_size == 0
    neg1 = n_total // batch_size                # 1 positive slab + NEG negative slabs
    neg = neg1 - 1
    assert neg >= 1, "need at least one negative sample"
    assert margin >= 0.0                        # zero-padded columns rely on max(0,-m)==0
    d = ent_emb.shape[-1]

    bp = int(pl.cdiv(batch_size, 128)) * 128    # lane-aligned (padded) batch
    pad = bp - batch_size

    # Pre-transposed, compute-dtype tables: the batch lands on the minor (lane)
    # axis straight out of the gather -- no post-gather transpose of the batch.
    ent_t = ent_emb.T.astype(compute_dtype)     # (D, n_ent)
    rel_t = rel_emb.T.astype(compute_dtype)     # (D, n_rel)

    def prep(table_t, idx, slabs):
        g = jnp.take(table_t, idx, axis=1)      # (D, slabs*B), batch minor
        if pad:
            g = g.reshape(d, slabs, batch_size)
            g = jnp.pad(g, ((0, 0), (0, 0), (0, pad)))   # zero cols -> hinge adds 0
            g = g.reshape(d, slabs * bp)
        return g

    h_e = prep(ent_t, batch_h, neg1)                          # (D, neg1*Bp)
    t_e = prep(ent_t, batch_t, neg1)
    if relations_repeated:
        r_e = prep(rel_t, batch_r[:batch_size], 1)            # (D, Bp), slab 0 only
    else:
        r_e = prep(rel_t, batch_r, neg1)                      # (D, neg1*Bp)

    in_itemsize = jnp.dtype(compute_dtype).itemsize
    block_budget, vmem_limit = _vmem_budgets()
    if block_b is None:
        tb = _choose_block_b(bp, d, in_itemsize, block_budget, min_grid_steps)
    else:
        tb = int(block_b)
        assert bp % tb == 0 and (tb % 128 == 0 or tb == bp), (batch_size, tb)
    nb = bp // tb

    kernel = functools.partial(_negative_sampling_kernel, margin=float(margin))
    slab_spec = pl.BlockSpec((d, tb), lambda i, k: (0, k * nb + i))
    if relations_repeated:
        # Slab-invariant index map: the pipeline keeps the same r block resident
        # across the inner slab axis (no redundant DMA).
        r_spec = pl.BlockSpec((d, tb), lambda i, k: (0, i))
    else:
        r_spec = slab_spec

    partials = pl.pallas_call(
        kernel,
        out_shape=jax.ShapeDtypeStruct((1, bp), jnp.float32),
        grid=(nb, neg1),
        in_specs=[slab_spec, slab_spec, r_spec],
        out_specs=pl.BlockSpec((1, tb), lambda i, k: (0, i)),   # lane-dense partials
        scratch_shapes=[pltpu.VMEM((1, tb), jnp.float32)],      # positive-score carry
        compiler_params=pltpu.CompilerParams(
            dimension_semantics=("parallel", "arbitrary"),      # batch tiles / slabs
            vmem_limit_bytes=vmem_limit,
        ),
    )(h_e, t_e, r_e)

    # Exact mean regardless of tiling/padding: padded columns contribute exactly 0.
    return jnp.sum(partials) / (neg * batch_size) + margin


def _reference_forward(ent_emb, rel_emb, batch_h, batch_t, batch_r,
                       batch_size, margin=MARGIN, compute_dtype=jnp.float32):
    """Pure-JAX reference mirroring the PyTorch module semantics exactly."""
    def l2n(x):
        ss = jnp.sum(x * x, axis=-1, keepdims=True)
        return x * jax.lax.rsqrt(jnp.maximum(ss, EPS * EPS))

    def q(x):  # optional bf16 round-trip to mirror the kernel's input dtype
        return x.astype(compute_dtype).astype(jnp.float32)

    h = l2n(q(ent_emb[batch_h]))
    t = l2n(q(ent_emb[batch_t]))
    r = l2n(q(rel_emb[batch_r]))
    score = jnp.sum(jnp.abs(h + r - t), axis=-1)                # flat (N,)
    p = score[:batch_size].reshape(-1, batch_size).T            # (B, 1)
    n = score[batch_size:].reshape(-1, batch_size).T            # (B, NEG)
    return jnp.mean(jnp.maximum(p - n, -margin)) + margin


if __name__ == "__main__":
    # Small, module-consistent shapes (batch_size matches the module default).
    batch_size = 256      # B
    num_neg = 2           # negatives per positive
    dim = 32              # embedding dim D
    n_ent = 500
    n_rel = 40
    n_total = batch_size * (1 + num_neg)

    key = jax.random.PRNGKey(0)
    k_e, k_r, k_h, k_t, k_rel = jax.random.split(key, 5)

    ent_emb = jax.random.uniform(k_e, (n_ent, dim), jnp.float32, -0.25, 0.25)
    rel_emb = jax.random.uniform(k_r, (n_rel, dim), jnp.float32, -0.25, 0.25)

    # head / tail / relation index arrays, length (1+NEG)*B (slab layout).
    batch_h = jax.random.randint(k_h, (n_total,), 0, n_ent, dtype=jnp.int32)
    batch_t = jax.random.randint(k_t, (n_total,), 0, n_ent, dtype=jnp.int32)
    batch_r = jax.random.randint(k_rel, (n_total,), 0, n_rel, dtype=jnp.int32)

    # 1) f32 path, explicit 128 tile -> grid (2, 3): validates tiling + slab carries.
    loss_f32 = negative_sampling_forward(ent_emb, rel_emb, batch_h, batch_t, batch_r,
                                         batch_size, block_b=128,
                                         compute_dtype=jnp.float32)
    loss_f32 = jax.block_until_ready(loss_f32)
    ref_f32 = _reference_forward(ent_emb, rel_emb, batch_h, batch_t, batch_r, batch_size)
    assert jnp.allclose(loss_f32, ref_f32, rtol=1e-4, atol=1e-4), (loss_f32, ref_f32)

    # 2) default bf16-input fast path with auto (budget-aware) tile selection.
    loss_bf16 = negative_sampling_forward(ent_emb, rel_emb, batch_h, batch_t, batch_r,
                                          batch_size)
    loss_bf16 = jax.block_until_ready(loss_bf16)
    ref_bf16 = _reference_forward(ent_emb, rel_emb, batch_h, batch_t, batch_r,
                                  batch_size, compute_dtype=jnp.bfloat16)
    assert jnp.allclose(loss_bf16, ref_bf16, rtol=1e-4, atol=1e-4), (loss_bf16, ref_bf16)
    assert jnp.allclose(loss_bf16, ref_f32, rtol=1e-2, atol=5e-2), (loss_bf16, ref_f32)

    # 3) OpenKE corruption pattern (relations repeat across slabs) -> r-dedup path.
    batch_r_rep = jnp.tile(batch_r[:batch_size], 1 + num_neg)
    loss_rep = negative_sampling_forward(ent_emb, rel_emb, batch_h, batch_t, batch_r_rep,
                                         batch_size, compute_dtype=jnp.float32,
                                         relations_repeated=True)
    loss_rep = jax.block_until_ready(loss_rep)
    ref_rep = _reference_forward(ent_emb, rel_emb, batch_h, batch_t, batch_r_rep,
                                 batch_size)
    assert jnp.allclose(loss_rep, ref_rep, rtol=1e-4, atol=1e-4), (loss_rep, ref_rep)

    # 4) non-128-aligned batch -> zero-padded lanes contribute exactly 0 to the mean.
    bs_odd = 192
    n_odd = bs_odd * (1 + num_neg)
    loss_odd = negative_sampling_forward(ent_emb, rel_emb, batch_h[:n_odd],
                                         batch_t[:n_odd], batch_r[:n_odd],
                                         bs_odd, compute_dtype=jnp.float32)
    loss_odd = jax.block_until_ready(loss_odd)
    ref_odd = _reference_forward(ent_emb, rel_emb, batch_h[:n_odd], batch_t[:n_odd],
                                 batch_r[:n_odd], bs_odd)
    assert jnp.allclose(loss_odd, ref_odd, rtol=1e-4, atol=1e-4), (loss_odd, ref_odd)

    print("KERNEL_OK")
</pallas_src>

<mosaic_0001>
module attributes {stable_mosaic.version = 11 : i64} {
  func.func @_negative_sampling_kernel(%arg0: i32, %arg1: i32, %arg2: memref<32x128xf32, #tpu.memory_space<vmem>>, %arg3: memref<32x128xf32, #tpu.memory_space<vmem>>, %arg4: memref<32x128xf32, #tpu.memory_space<vmem>>, %arg5: memref<1x128xf32, #tpu.memory_space<vmem>>, %arg6: memref<1x128xf32, #tpu.memory_space<vmem>>) attributes {dimension_semantics = [#tpu.dimension_semantics<parallel>, #tpu.dimension_semantics<arbitrary>], iteration_bounds = array<i64: 2, 3>, scalar_prefetch = 0 : i64, scratch_operands = 1 : i64, tpu.core_type = #tpu.core_type<tc>, window_params = [{transform_indices = @transform_0, window_bounds = array<i64: 32, 128>}, {transform_indices = @transform_1, window_bounds = array<i64: 32, 128>}, {transform_indices = @transform_2, window_bounds = array<i64: 32, 128>}, {transform_indices = @transform_3, window_bounds = array<i64: 1, 128>}]} {
    %c0 = arith.constant 0 : index
    %c0_0 = arith.constant 0 : index
    %0 = vector.load %arg2[%c0, %c0_0] : memref<32x128xf32, #tpu.memory_space<vmem>>, vector<32x128xf32>
    %1 = arith.mulf %0, %0 : vector<32x128xf32>
    %cst = arith.constant dense<0.000000e+00> : vector<128xf32>
    %2 = vector.multi_reduction <add>, %1, %cst [0] : vector<32x128xf32> to vector<128xf32>
    %3 = vector.shape_cast %2 : vector<128xf32> to vector<1x128xf32>
    %cst_1 = arith.constant 1.000000e-24 : f32
    %4 = vector.broadcast %cst_1 : f32 to vector<1x128xf32>
    %5 = arith.maximumf %3, %4 : vector<1x128xf32>
    %6 = math.rsqrt %5 : vector<1x128xf32>
    %7 = vector.broadcast %6 : vector<1x128xf32> to vector<32x128xf32>
    %8 = arith.mulf %0, %7 : vector<32x128xf32>
    %c0_2 = arith.constant 0 : index
    %c0_3 = arith.constant 0 : index
    %9 = vector.load %arg4[%c0_2, %c0_3] : memref<32x128xf32, #tpu.memory_space<vmem>>, vector<32x128xf32>
    %10 = arith.mulf %9, %9 : vector<32x128xf32>
    %cst_4 = arith.constant dense<0.000000e+00> : vector<128xf32>
    %11 = vector.multi_reduction <add>, %10, %cst_4 [0] : vector<32x128xf32> to vector<128xf32>
    %12 = vector.shape_cast %11 : vector<128xf32> to vector<1x128xf32>
    %cst_5 = arith.constant 1.000000e-24 : f32
    %13 = vector.broadcast %cst_5 : f32 to vector<1x128xf32>
    %14 = arith.maximumf %12, %13 : vector<1x128xf32>
    %15 = math.rsqrt %14 : vector<1x128xf32>
    %16 = vector.broadcast %15 : vector<1x128xf32> to vector<32x128xf32>
    %17 = arith.mulf %9, %16 : vector<32x128xf32>
    %18 = arith.addf %8, %17 : vector<32x128xf32>
    %c0_6 = arith.constant 0 : index
    %c0_7 = arith.constant 0 : index
    %19 = vector.load %arg3[%c0_6, %c0_7] : memref<32x128xf32, #tpu.memory_space<vmem>>, vector<32x128xf32>
    %20 = arith.mulf %19, %19 : vector<32x128xf32>
    %cst_8 = arith.constant dense<0.000000e+00> : vector<128xf32>
    %21 = vector.multi_reduction <add>, %20, %cst_8 [0] : vector<32x128xf32> to vector<128xf32>
    %22 = vector.shape_cast %21 : vector<128xf32> to vector<1x128xf32>
    %cst_9 = arith.constant 1.000000e-24 : f32
    %23 = vector.broadcast %cst_9 : f32 to vector<1x128xf32>
    %24 = arith.maximumf %22, %23 : vector<1x128xf32>
    %25 = math.rsqrt %24 : vector<1x128xf32>
    %26 = vector.broadcast %25 : vector<1x128xf32> to vector<32x128xf32>
    %27 = arith.mulf %19, %26 : vector<32x128xf32>
    %28 = arith.subf %18, %27 : vector<32x128xf32>
    %29 = math.absf %28 : vector<32x128xf32>
    %cst_10 = arith.constant dense<0.000000e+00> : vector<128xf32>
    %30 = vector.multi_reduction <add>, %29, %cst_10 [0] : vector<32x128xf32> to vector<128xf32>
    %31 = vector.shape_cast %30 : vector<128xf32> to vector<1x128xf32>
    %c0_i32 = arith.constant 0 : i32
    %32 = arith.cmpi eq, %arg1, %c0_i32 : i32
    %33 = arith.extui %32 : i1 to i32
    %c0_i32_11 = arith.constant 0 : i32
    %34 = arith.cmpi ne, %33, %c0_i32_11 : i32
    scf.if %34 {
      %c0_14 = arith.constant 0 : index
      %c0_15 = arith.constant 0 : index
      %38 = vector.load %arg6[%c0_14, %c0_15] : memref<1x128xf32, #tpu.memory_space<vmem>>, vector<1x128xf32>
      tpu.vector_store %arg6[%c0_14, %c0_15], %31 {strides = array<i32>} : memref<1x128xf32, #tpu.memory_space<vmem>>, vector<1x128xf32>,
      %cst_16 = arith.constant 0.000000e+00 : f32
      %39 = vector.broadcast %cst_16 : f32 to vector<1x128xf32>
      %c0_17 = arith.constant 0 : index
      %c0_18 = arith.constant 0 : index
      %40 = vector.load %arg5[%c0_17, %c0_18] : memref<1x128xf32, #tpu.memory_space<vmem>>, vector<1x128xf32>
      tpu.vector_store %arg5[%c0_17, %c0_18], %39 {strides = array<i32>} : memref<1x128xf32, #tpu.memory_space<vmem>>, vector<1x128xf32>,
    } else {
    }
    %c0_i32_12 = arith.constant 0 : i32
    %35 = arith.cmpi sgt, %arg1, %c0_i32_12 : i32
    %36 = arith.extui %35 : i1 to i32
    %c0_i32_13 = arith.constant 0 : i32
    %37 = arith.cmpi ne, %36, %c0_i32_13 : i32
    scf.if %37 {
      %c0_14 = arith.constant 0 : index
      %c0_15 = arith.constant 0 : index
      %38 = vector.load %arg5[%c0_14, %c0_15] : memref<1x128xf32, #tpu.memory_space<vmem>>, vector<1x128xf32>
      %c0_16 = arith.constant 0 : index
      %c0_17 = arith.constant 0 : index
      %39 = vector.load %arg6[%c0_16, %c0_17] : memref<1x128xf32, #tpu.memory_space<vmem>>, vector<1x128xf32>
      %40 = arith.subf %39, %31 : vector<1x128xf32>
      %cst_18 = arith.constant -4.000000e+00 : f32
      %41 = vector.broadcast %cst_18 : f32 to vector<1x128xf32>
      %42 = arith.maximumf %40, %41 : vector<1x128xf32>
      %43 = arith.addf %38, %42 : vector<1x128xf32>
      %c0_19 = arith.constant 0 : index
      %c0_20 = arith.constant 0 : index
      %44 = vector.load %arg5[%c0_19, %c0_20] : memref<1x128xf32, #tpu.memory_space<vmem>>, vector<1x128xf32>
      tpu.vector_store %arg5[%c0_19, %c0_20], %43 {strides = array<i32>} : memref<1x128xf32, #tpu.memory_space<vmem>>, vector<1x128xf32>,
    } else {
    }
    return
  }
  func.func @transform_0(%arg0: i32, %arg1: i32) -> (i32, i32) {
    %c2_i32 = arith.constant 2 : i32
    %0 = arith.muli %arg1, %c2_i32 : i32
    %1 = arith.addi %0, %arg0 : i32
    %c0_i32 = arith.constant 0 : i32
    %c0_i32_0 = arith.constant 0 : i32
    return %c0_i32, %1 : i32, i32
  }
  func.func @transform_1(%arg0: i32, %arg1: i32) -> (i32, i32) {
    %c2_i32 = arith.constant 2 : i32
    %0 = arith.muli %arg1, %c2_i32 : i32
    %1 = arith.addi %0, %arg0 : i32
    %c0_i32 = arith.constant 0 : i32
    %c0_i32_0 = arith.constant 0 : i32
    return %c0_i32, %1 : i32, i32
  }
  func.func @transform_2(%arg0: i32, %arg1: i32) -> (i32, i32) {
    %c2_i32 = arith.constant 2 : i32
    %0 = arith.muli %arg1, %c2_i32 : i32
    %1 = arith.addi %0, %arg0 : i32
    %c0_i32 = arith.constant 0 : i32
    %c0_i32_0 = arith.constant 0 : i32
    return %c0_i32, %1 : i32, i32
  }
  func.func @transform_3(%arg0: i32, %arg1: i32) -> (i32, i32) {
    %c0_i32 = arith.constant 0 : i32
    %c0_i32_0 = arith.constant 0 : i32
    return %c0_i32, %arg0 : i32, i32
  }
}

</mosaic_0001>

<bundles_post_ra>
// kernel: tpu_custom_call.1
= control target key start
LH: loop header
LB: loop body
LE: loop exit
PB: predicated region body
PF: predicated region fallthrough
CT: control target
= control target key end

     0   :  { %s1243_s0 = inlined_call_operand.hbm [shape: f32[32,768], index: 0, kind: input, shape index: {}]   ;;  %s1244_s1 = inlined_call_operand.hbm [shape: f32[32,768], index: 1, kind: input, shape index: {}]   ;;  %s1245_s2 = inlined_call_operand.hbm [shape: f32[32,768], index: 2, kind: input, shape index: {}]   ;;  %s1246_s3 = inlined_call_operand.hbm [shape: f32[1,256], index: 3, kind: output, shape index: {}]  }
   0x1   :  { %1259 = sst [smem:[#allocation25_spill]] %s1244_s1 }
   0x2   :  { %8 = vsyncpa [#allocation4], 0 }
   0x3   :  { %10 = vsyncpa [#allocation4 + $0x1], 0 }
   0x4   :  { %11 = vsyncpa [#allocation7], 0 }
   0x5   :  { %13 = vsyncpa [#allocation7 + $0x1], 0 }
   0x6   :  { %14 = vsyncpa [#allocation5], 0 }
   0x7   :  { %16 = vsyncpa [#allocation5 + $0x1], 0  ;;  %s967_s12 = smov 0   ;;  %s969_s13 = smov 0  }
   0x8   :  { %s971_s14 = smov 0   ;;  %s973_s15 = smov 0  }
   0x9   :  { %s975_s16 = smov 0   ;;  %s977_s17 = smov 0  }
   0xa   :  { %s979_s18 = smov 0   ;;  %s981_s19 = smov 0  }
   0xb   :  { %s983_s20 = smov 0   ;;  %s985_s21 = smov 0  }
   0xc   :  { %s987_s22 = smov 0  }
   0xd LB: > { %1260 = sst [smem:[#allocation13_spill]] %s901_s12  ;;  %s1021_s23 = sadd.s32 4294967295, %s941_s22   ;;  %s941_s22 = sphi %s987_s22, %s22_s22   ;;  %s937_s21 = sphi %s985_s21, %s1290_s21   ;;  %s933_s20 = sphi %s983_s20, %s1289_s20   ;;  %s929_s19 = sphi %s981_s19, %s1288_s19   ;;  %s925_s18 = sphi %s979_s18, %s1287_s18   ;;  %s921_s17 = sphi %s977_s17, %s1286_s17   ;;  %s917_s16 = sphi %s975_s16, %s1294_s16   ;;  %s913_s15 = sphi %s973_s15, %s1293_s15   ;;  %s909_s14 = sphi %s971_s14, %s1284_s14   ;;  %s905_s13 = sphi %s969_s13, %s1292_s13   ;;  %s901_s12 = sphi %s967_s12, %s1291_s12  }
   0xe   : > { %1261 = sst [smem:[#allocation14_spill]] %s909_s14  ;;  %s577_s24 = sadd.s32 4294967294, %s941_s22  }
   0xf   : > { %1262 = sst [smem:[#allocation15_spill]] %s921_s17  ;;  %s31_s25 = sadd.s32 1, %s933_s20 }
  0x10   : > { %1263 = sst [smem:[#allocation16_spill]] %s933_s20  ;;  %s34_s26 = sadd.s32 1, %s937_s21 }
  0x11   : > { %1264 = sst [smem:[#allocation17_spill]] %s937_s21  ;;  %p32_p0 = scmp.ge.s32.totalorder %s31_s25, 3 }
  0x12   : > { %1265 = sst [smem:[#allocation18_spill]] %s941_s22  ;;  %s578_s27 = sshll.u32 %s933_s20, 1 }
  0x13   : > { %s39_s28 = sadd.s32 %s937_s21, %s578_s27  ;;  %s45_s29 = sadd.s32 1, %s921_s17 }
  0x14   : > { %s1296_s25 = smov (%p32_p0, %s31_s25), 0  ;;  %s1298_s26 = smov (!%p32_p0, %s34_s26), %s937_s21 }
  0x15   : > { %1266 = sst [smem:[#allocation19_spill]] %s1296_s25  ;;  %s579_s30 = sshll.u32 %s1296_s25, 1 }
  0x16   : > { %p52_p1 = scmp.ne.s32.totalorder %s921_s17, %s917_s16  ;;  %p36_p2 = scmp.ge.s32.totalorder %s1298_s26, 2 }
  0x17   : > { %p53_p3 = scmp.eq.s32.totalorder %s941_s22, 0  ;;  %p58_p4 = scmp.ne.s32.totalorder %s917_s16, %s913_s15 }
  0x18   : > { %p59_p5 = scmp.eq.s32.totalorder %s1021_s23, 0  ;;  %s1300_s26 = smov (%p36_p2, %s1298_s26), 0 }
  0x19   : > { %1267 = sst [smem:[#allocation20_spill]] %s1300_s26  ;;  %p1040_p6 = por %p53_p3, %p52_p1 }
  0x1a   : > { %p1044_p7 = por %p59_p5, %p58_p4  ;;  %s41_s6 = sadd.s32 %s579_s30, %s1300_s26 }
  0x1b   : > { %s128_s7 = ssub.s32 %s937_s21, %s1300_s26  ;;  %s42_s8 = ssub.s32 %s39_s28, %s41_s6 }
  0x1c   : > { %p129_p8 = scmp.eq.s32.totalorder %s128_s7, 0  ;;  %p43_p9 = scmp.eq.s32.totalorder %s42_s8, 0 }
  0x1d   : > { %s131_s9 = sadd.s32 1, %s909_s14  ;;  %p141_p10 = scmp.ne.s32.totalorder %s909_s14, %s905_s13 }
  0x1e   : > { %s1053_s10 = scalar_select %p129_p8, %s909_s14, %s131_s9  }
  0x1f   : > { %s1056_s11 = scalar_select %p43_p9, %s921_s17, %s45_s29  }
  0x20   : > { %1270 = sst [smem:[#allocation21_spill]] %s1053_s10  ;;  %p142_p11 = scmp.eq.s32.totalorder %s1021_s23, 5 }
  0x21   : > { %1271 = sst [smem:[#allocation22_spill]] %s1056_s11  ;;  %p147_p12 = scmp.ne.s32.totalorder %s905_s13, %s901_s12 }
  0x22   : > { %p148_p13 = scmp.eq.s32.totalorder %s577_s24, 5  ;;  %p1065_p0 = por %p142_p11, %p141_p10 }
  0x23   : > { %p625_p2 = scmp.lt.s32.totalorder %s941_s22, 6  ;;  %s168_s30 = sand.u32 1, %s921_s17  }
  0x24   : > { %s1272_s15 = scalar_select %p1065_p0, 1, 0 }
  0x25   : > { %p1069_p1 = por %p148_p13, %p147_p12  ;;  %s1075_s6 = sshll.u32 %s39_s28, 3 }
  0x26   : > { %1273 = sst [smem:[#allocation23_spill]] %s1272_s15  ;;  %s1077_s29 = sshll.u32 %s168_s30, 5 }
  0x27   : > { %s1274_s27 = scalar_select %p1069_p1, 1, 0 }
  0x28   : > { %p1081_p3 = pnand %p625_p2, %p1040_p6  ;;  %s191_s7 = sand.u32 1, %s941_s22  }
  0x29   : > { %1275 = sst [smem:[#allocation24_spill]] %s1274_s27  ;;  %s195_s25 = scalar_lea.vmem [#allocation6], %s1077_s29 }
  0x2a   : > { %s1277_s1 = sld [smem:[#allocation25_spill]]  ;;  %s204_s21 = sshll.u32 %s195_s25, 4  ;;  %s205_s21 = int_to_ptr.vmem [resolvable:$true] %s204_s21 }
  0x2b   : > { %s192_s4 = scalar_lea.sflag [#allocation7], %s191_s7  ;;  %s943_s20 = smov 768  }
  0x2c   : > { %s944_s11 = smov 128   ;;  %s945_s17 = smov 8  }
  0x2d   : > { %p595_p4 = scmp.ge.s32.totalorder %s941_s22, 1  ;;  %p235_p5 = scmp.lt.s32.totalorder %s941_s22, 7 }
  0x2e   : > { %s178_s9 = scalar_lea.hbm %s1243_s0, %s1075_s6  ;;  %s172_s7 = scalar_lea.vmem [#allocation3], %s1077_s29 }
  0x2f   : > { %p1095_p6 = pnand %p595_p4, %p235_p5  ;;  %s181_s10 = sshll.u32 %s172_s7, 4  ;;  %s182_s10 = int_to_ptr.vmem [resolvable:$true] %s181_s10 }
  0x30   : > { %s201_s26 = scalar_lea.hbm %s1277_s1, %s1075_s6  ;;  %s179_s1 = sshll.u32 %s178_s9, 4  ;;  %s180_s1 = int_to_ptr.hbm [resolvable:$true] %s179_s1 }
  0x31   : > { %s202_s28 = sshll.u32 %s201_s26, 4  ;;  %s169_s14 = scalar_lea.sflag [#allocation4], %s168_s30  ;;  %s203_s28 = int_to_ptr.hbm [resolvable:$true] %s202_s28 }
  0x32   : > { %617 = dma.hbm_to_vmem [thread:$0]  (!%p1081_p3), %s203_s28, 512, %s205_s21, %s192_s4, %s943_s20, %s944_s11, %s945_s17  }
  0x33   : > { %614 = dma.hbm_to_vmem [thread:$0]  (!%p1081_p3), %s180_s1, 512, %s182_s10, %s169_s14, %s943_s20, %s944_s11, %s945_s17  }
  0x34   : > { %s224_s27 = scalar_lea.hbm %s1245_s2, %s1075_s6  ;;  %s218_s22 = scalar_lea.vmem [#allocation8], %s1077_s29 }
  0x35   : > { %s225_s12 = sshll.u32 %s224_s27, 4  ;;  %s227_s15 = sshll.u32 %s218_s22, 4  ;;  %s226_s12 = int_to_ptr.hbm [resolvable:$true] %s225_s12  ;;  %s228_s15 = int_to_ptr.vmem [resolvable:$true] %s227_s15 }
  0x36   : > { %620 = dma.hbm_to_vmem [thread:$0]  (!%p1081_p3), %s226_s12, 512, %s228_s15, %s192_s4, %s943_s20, %s944_s11, %s945_s17  }
  0x37   : > { %239 = sbr.rel (%p1095_p6) target bundleno = 165 (0xa5), region = 32  ;;  %s241_s26 = sand.u32 (!%p1095_p6), 1, %s917_s16  }
  0x38   : > { %s596_s30 = sshll.u32 (!%p1095_p6), %s241_s26, 5  ;;  %s242_s25 = scalar_lea.sflag (!%p1095_p6), [#allocation4], %s241_s26 }
  0x39   : > { %s245_s1 = scalar_lea.vmem (!%p1095_p6), [#allocation3], %s596_s30 }
  0x3c   : > { %888 = dma.done.wait (%p1044_p7), %s242_s25, 512  }
  0x3d   : > { %890 = vsyncadd (%p1044_p7), %s242_s25, 4294966784  ;;  %s251_s14 = sand.u32 1, %s1021_s23   ;;  %s255_s10 = scalar_lea.vmem [#allocation6], %s596_s30 }
  0x3e   : > { %s252_s22 = scalar_lea.sflag [#allocation7], %s251_s14 }
  0x3f   : > { %892 = dma.done.wait (%p1044_p7), %s252_s22, 1024  }
  0x40   : > { %894 = vsyncadd (%p1044_p7), %s252_s22, 4294966272  ;;  %s296_s12 = sand.u32 1, %s905_s13   ;;  %v1126_v0 = vld [vmem:[%s245_s1] sm:$0xff]  ;;  %v1128_v1 = vld [vmem:[%s245_s1 + $0x8] sm:$0xff]  ;;  %s265_s17 = scalar_lea.vmem [#allocation8], %s596_s30 }
  0x41   : > { %v1130_v2 = vld [vmem:[%s245_s1 + $0x10] sm:$0xff]  ;;  %v1132_v3 = vld [vmem:[%s245_s1 + $0x18] sm:$0xff]  ;;  %v308_v4 = vmul.f32 %v1126_v0, %v1126_v0  ;;  %v309_v5 = vmul.f32 %v1128_v1, %v1128_v1  ;;  %v1140_v7 = vld [vmem:[%s265_s17] sm:$0xff]  ;;  %s297_s20 = scalar_lea.vmem [#allocation9], %s296_s12  ;;  %p599_p7 = scmp.ne.s32.totalorder %s925_s18, 0 }
  0x42   : > { %v310_v6 = vmul.f32 %v1130_v2, %v1130_v2  ;;  %v1142_v8 = vld [vmem:[%s265_s17 + $0x8] sm:$0xff]  ;;  %v1144_v9 = vld [vmem:[%s265_s17 + $0x10] sm:$0xff]  ;;  %v1146_v10 = vld [vmem:[%s265_s17 + $0x18] sm:$0xff]  ;;  %v340_v11 = vmul.f32 %v1140_v7, %v1140_v7  ;;  %v311_v14 = vmul.f32 %v1132_v3, %v1132_v3 }
  0x43   : > { %v341_v12 = vmul.f32 %v1142_v8, %v1142_v8  ;;  %v1152_v13 = vld [vmem:[%s255_s10] sm:$0xff]  ;;  %v312_v15 = vadd.f32 %v309_v5, %v308_v4  ;;  %v342_v16 = vmul.f32 %v1144_v9, %v1144_v9  ;;  %v1158_v17 = vld [vmem:[%s255_s10 + $0x8] sm:$0xff]  ;;  %v1160_v18 = vld [vmem:[%s255_s10 + $0x10] sm:$0xff]  ;;  %v343_v21 = vmul.f32 %v1146_v10, %v1146_v10 }
  0x44   : > { %v1162_v19 = vld [vmem:[%s255_s10 + $0x18] sm:$0xff]  ;;  %v376_v20 = vmul.f32 %v1152_v13, %v1152_v13  ;;  %v377_v23 = vmul.f32 %v1158_v17, %v1158_v17  ;;  %v378_v24 = vmul.f32 %v1160_v18, %v1160_v18 }
  0x45   : > { %v344_v22 = vadd.f32 %v341_v12, %v340_v11  ;;  %v313_v25 = vadd.f32 %v312_v15, %v310_v6  ;;  %v379_v27 = vmul.f32 %v1162_v19, %v1162_v19 }
  0x46   : > { %v380_v28 = vadd.f32 %v377_v23, %v376_v20 }
  0x47   : > { %v345_v26 = vadd.f32 %v344_v22, %v342_v16  ;;  %v314_v29 = vadd.f32 %v313_v25, %v311_v14 }
  0x48   : > { %v381_v31 = vadd.f32 %v380_v28, %v378_v24 }
  0x49   : > { %v346_v30 = vadd.f32 %v345_v26, %v343_v21  ;;  %v315_v32 = vrot.slane %v314_v29, 4 }
  0x4a   : > { %v382_v34 = vadd.f32 %v381_v31, %v379_v27 }
  0x4b   : > { %v347_v33 = vrot.slane %v346_v30, 4  ;;  %v316_v35 = vadd.f32 %v315_v32, %v314_v29 }
  0x4c   : > { %v383_v37 = vrot.slane %v382_v34, 4 }
  0x4d   : > { %v348_v36 = vadd.f32 %v347_v33, %v346_v30  ;;  %v317_v38 = vrot.slane %v316_v35, 2 }
  0x4e   : > { %v384_v40 = vadd.f32 %v383_v37, %v382_v34 }
  0x4f   : > { %v349_v39 = vrot.slane %v348_v36, 2  ;;  %v318_v41 = vadd.f32 %v317_v38, %v316_v35 }
  0x50   : > { %v385_v43 = vrot.slane %v384_v40, 2 }
  0x51   : > { %v350_v42 = vadd.f32 %v349_v39, %v348_v36  ;;  %v319_v44 = vrot.slane %v318_v41, 1 }
  0x52   : > { %v386_v46 = vadd.f32 %v385_v43, %v384_v40 }
  0x53   : > { %v351_v45 = vrot.slane %v350_v42, 1  ;;  %v320_v47 = vadd.f32 %v319_v44, %v318_v41 }
  0x54   : > { %v387_v49 = vrot.slane %v386_v46, 1 }
  0x55   : > { %v352_v48 = vadd.f32 %v351_v45, %v350_v42  ;;  %v321_v50 = vmax.f32 %v320_v47, 1e-24 }
  0x56   : > { %v388_v52 = vadd.f32 %v387_v49, %v386_v46 }
  0x57   : > { %v353_v51 = vmax.f32 %v352_v48, 1e-24  ;;  %719 = vrsqrt.f32 %v321_v50  ;;  %vm328_vm0 = vweird.f32 %v321_v50 }
  0x58   : > { %v389_v53 = vmax.f32 %v388_v52, 1e-24 }
  0x59   : > { %721 = vrsqrt.f32 %v353_v51  ;;  %vm360_vm2 = vweird.f32 %v353_v51 }
  0x5a   : > { %723 = vrsqrt.f32 %v389_v53  ;;  %vm396_vm5 = vweird.f32 %v389_v53 }
  0x5d   : > { %v720_v54 = vpop.eup %719 }
  0x5e   : > { %v323_v56 = vmul.f32 %v720_v54, %v321_v50  ;;  %vm329_vm1 = vweird.f32 %v720_v54 }
  0x5f   : > { %v722_v55 = vpop.eup %721  ;;  %vm330_vm4 = vmor %vm328_vm0, %vm329_vm1 }
  0x60   : > { %v355_v57 = vmul.f32 %v722_v55, %v353_v51  ;;  %v724_v58 = vpop.eup %723  ;;  %v324_v59 = vmul.f32 %v720_v54, %v323_v56  ;;  %vm361_vm3 = vweird.f32 %v722_v55 }
  0x61   : > { %v391_v61 = vmul.f32 %v724_v58, %v389_v53  ;;  %vm397_vm6 = vweird.f32 %v724_v58  ;;  %vm362_vm7 = vmor %vm360_vm2, %vm361_vm3 }
  0x62   : > { %v356_v60 = vmul.f32 %v722_v55, %v355_v57  ;;  %v325_v62 = vmul.f32 0.5, %v324_v59  ;;  %vm398_vm8 = vmor %vm396_vm5, %vm397_vm6 }
  0x63   : > { %v392_v4 = vmul.f32 %v724_v58, %v391_v61 }
  0x64   : > { %v357_v63 = vmul.f32 0.5, %v356_v60  ;;  %v326_v5 = vsub.f32 1.5, %v325_v62 }
  0x65   : > { %v393_v11 = vmul.f32 0.5, %v392_v4 }
  0x66   : > { %v358_v6 = vsub.f32 1.5, %v357_v63  ;;  %v327_v12 = vmul.f32 %v720_v54, %v326_v5 }
  0x67   : > { %v394_v15 = vsub.f32 1.5, %v393_v11 }
  0x68   : > { %v359_v14 = vmul.f32 %v722_v55, %v358_v6  ;;  %v331_v16 = vsel %vm330_vm4, %v720_v54, %v327_v12 }
  0x69   : > { %v332_v20 = vmul.f32 %v331_v16, %v1126_v0  ;;  %v333_v21 = vmul.f32 %v331_v16, %v1128_v1  ;;  %v334_v22 = vmul.f32 %v331_v16, %v1130_v2  ;;  %v335_v23 = vmul.f32 %v331_v16, %v1132_v3 }
  0x6a   : > { %v363_v24 = vsel %vm362_vm7, %v722_v55, %v359_v14  ;;  %v395_v25 = vmul.f32 %v724_v58, %v394_v15 }
  0x6b   : > { %v364_v26 = vmul.f32 %v363_v24, %v1140_v7  ;;  %v365_v27 = vmul.f32 %v363_v24, %v1142_v8  ;;  %v366_v28 = vmul.f32 %v363_v24, %v1144_v9  ;;  %v367_v29 = vmul.f32 %v363_v24, %v1146_v10 }
  0x6c   : > { %v399_v30 = vsel %vm398_vm8, %v724_v58, %v395_v25 }
  0x6d   : > { %v368_v31 = vadd.f32 %v364_v26, %v332_v20  ;;  %v369_v0 = vadd.f32 %v365_v27, %v333_v21  ;;  %v370_v32 = vadd.f32 %v366_v28, %v334_v22  ;;  %v371_v1 = vadd.f32 %v367_v29, %v335_v23 }
  0x6e   : > { %v400_v2 = vmul.f32 %v399_v30, %v1152_v13  ;;  %v401_v3 = vmul.f32 %v399_v30, %v1158_v17  ;;  %v402_v33 = vmul.f32 %v399_v30, %v1160_v18  ;;  %v403_v34 = vmul.f32 %v399_v30, %v1162_v19 }
  0x70   : > { %v404_v7 = vsub.f32 %v368_v31, %v400_v2  ;;  %v405_v35 = vsub.f32 %v369_v0, %v401_v3  ;;  %v406_v8 = vsub.f32 %v370_v32, %v402_v33  ;;  %v407_v9 = vsub.f32 %v371_v1, %v403_v34 }
  0x72   : > { %v408_v36 = vand.u32 2147483647, %v404_v7  ;;  %v409_v10 = vand.u32 2147483647, %v405_v35  ;;  %v410_v37 = vand.u32 2147483647, %v406_v8 }
  0x73   : > { %v411_v38 = vand.u32 2147483647, %v407_v9 }
  0x74   : > { %v412_v39 = vadd.f32 %v409_v10, %v408_v36 }
  0x76   : > { %v413_v40 = vadd.f32 %v412_v39, %v410_v37 }
  0x78   : > { %v414_v41 = vadd.f32 %v413_v40, %v411_v38 }
  0x7a   : > { %v415_v42 = vrot.slane %v414_v41, 4 }
  0x7c   : > { %v416_v13 = vadd.f32 %v415_v42, %v414_v41 }
  0x7e   : > { %v417_v43 = vrot.slane %v416_v13, 2 }
  0x80   : > { %v418_v17 = vadd.f32 %v417_v43, %v416_v13  ;;  %424 = sbr.rel (%p599_p7) target bundleno = 136 (0x88), region = 48 }
  0x82   : > { %v419_v44 = vrot.slane %v418_v17, 1 }
  0x84   : > { %v420_v18 = vadd.f32 %v419_v44, %v418_v17 }
  0x85   : > { %v946_v19 = vmov 0.0  }
  0x86   : > { %425 = vst [vmem:[#allocation2] sm:$0x1] %v420_v18 }
  0x87   : > { %426 = vst [vmem:[%s297_s20] sm:$0x1] %v946_v19 }
  0x88 PF: > { %p600_p8 = scmp.le.s32.totalorder %s925_s18, 0 }
  0x8a   : > { %430 = sbr.rel (%p600_p8) target bundleno = 151 (0x97), region = 52 }
  0x8f   : > { %v432_v45 = vld [vmem:[#allocation2] sm:$0x1] }
  0x90   : > { %v433_v46 = vsub.f32 %v432_v45, %v420_v18  ;;  %v431_v47 = vld [vmem:[%s297_s20] sm:$0x1] }
  0x92   : > { %v434_v48 = vmax.f32 %v433_v46, -4.0 }
  0x94   : > { %v435_v49 = vadd.f32 %v434_v48, %v431_v47 }
  0x96   : > { %436 = vst [vmem:[%s297_s20] sm:$0x1] %v435_v49 }
  0x97 PF: > { %s446_s15 = scalar_lea.hbm %s1246_s3, %s929_s19  ;;  %s448_s27 = sshll.u32 %s297_s20, 4  ;;  %s449_s27 = int_to_ptr.vmem [resolvable:$true] %s448_s27 }
  0x98   : > { %s450_s6 = sshll.u32 %s446_s15, 4  ;;  %s438_s18 = scalar_lea.sflag [#allocation5], %s296_s12  ;;  %s451_s6 = int_to_ptr.hbm [resolvable:$true] %s450_s6 }
  0x99   : > { %s829_s29 = sshra.s32 %s451_s6, 4  ;;  %s835_s9 = scalar_lea.hbm %s1246_s3, 2  ;;  %s830_s29 = int_to_ptr.hbm [resolvable:$true] %s829_s29 }
  0x9a   : > { %s831_s24 = scalar_lea.hbm %s830_s29, 1  ;;  %p836_p12 = scmp.lt.s32.totalorder %s830_s29, %s1246_s3 }
  0x9b   : > { %p832_p9 = scmp.ne.s32.totalorder %s830_s29, %s831_s24  ;;  %p837_p13 = scmp.lt.s32.totalorder %s835_s9, %s831_s24 }
  0x9d   : > { %p833_p10 = pnand %p832_p9, %p1065_p0  ;;  %p838_p2 = por %p837_p13, %p836_p12 }
  0x9f   : > { %p834_p11 = pneg %p833_p10 }
  0xa1   : > { %p839_p3 = pnand %p838_p2, %p834_p11 }
  0xa3   : > { %842 = shalt.err (!%p839_p3)
}
  0xa4   : > { %609 = dma.vmem_to_hbm [thread:$0]  (%p1065_p0), %s449_s27, 16, %s451_s6, %s438_s18  }
  0xa5 PF: > { %s1280_s19 = sld [smem:[#allocation18_spill]] }
  0xa6   : > { %s1281_s28 = sld [smem:[#allocation13_spill]] }
  0xab   : > { %p626_p4 = scmp.ge.s32.totalorder %s1280_s19, 2 }
  0xac   : > { %s462_s30 = sand.u32 1, %s1281_s28  }
  0xad   : > { %p622_p5 = pnand %p626_p4, %p1069_p1  ;;  %s463_s25 = scalar_lea.sflag [#allocation5], %s462_s30 }
  0xaf   : > { %p623_p6 = pneg %p622_p5 }
  0xb1   : > { %896 = dma.done.wait (%p623_p6), %s463_s25, 16  }
  0xb2   : > { %898 = vsyncadd (%p623_p6), %s463_s25, 4294967280  ;;  %s22_s22 = sadd.s32 1, %s1280_s19   ;;  %s1283_s1 = sld [smem:[#allocation14_spill]] }
  0xb3   : > { %p19_p7 = scmp.ge.s32.totalorder %s22_s22, 8   ;;  %s1284_s14 = sld [smem:[#allocation21_spill]] }
  0xb4   : > { %s1285_s10 = sld [smem:[#allocation15_spill]]  ;;  %s1291_s12 = smov %s905_s13 }
  0xb5   : > { %s1286_s17 = sld [smem:[#allocation22_spill]]  ;;  %s1293_s15 = smov %s917_s16 }
  0xb6   : > { %s1287_s18 = sld [smem:[#allocation16_spill]]  ;;  %21 = sbr.rel (!%p19_p7) target bundleno = 13 (0xd), region = 109 }
  0xb7   : > { %s1288_s19 = sld [smem:[#allocation17_spill]] }
  0xb8   : > { %s1289_s20 = sld [smem:[#allocation19_spill]]  ;;  %s1292_s13 = smov %s1283_s1 }
  0xb9   : > { %s1290_s21 = sld [smem:[#allocation20_spill]] }
  0xba   : > { %s1294_s16 = smov %s1285_s10 }
  0xbb   :  { %468 = vsyncpa [#allocation4], 1 }
  0xbc   :  { %470 = vsyncpa [#allocation4 + $0x1], 1 }
  0xbd   :  { %471 = vsyncpa [#allocation7], 1 }
  0xbe   :  { %473 = vsyncpa [#allocation7 + $0x1], 1 }
  0xbf   :  { %474 = vsyncpa [#allocation5], 1 }
  0xc0   :  { %476 = vsyncpa [#allocation5 + $0x1], 1 }

</bundles_post_ra>
